<compile_context>
chip_gen: v6e
topology: v6e:2x2x1
jax: 0.10.0
libtpu: 0.0.40
codegen_flags: <defaults>
</compile_context>

<pallas_src>
import jax
import jax.numpy as jnp
from jax import lax
from jax.experimental import pallas as pl
from jax.experimental.pallas import tpu as pltpu


def _s3pool_kernel(x_ref, o_ref):
    # x_ref: (1, TC, H, W)  one batch element, one channel tile (NCHW).
    # o_ref: (1, TC, Ho, Wo), Ho = H//2 + 1, Wo = W//2 + 1.
    _, TC, H, W = x_ref.shape
    Ho, Wo = o_ref.shape[2], o_ref.shape[3]
    Hm, Wm = H - 1, W - 1          # valid MaxPool2d(k=2, s=1) extent
    f32 = jnp.float32

    # ConstantPad2d((0,1,0,1)) + AvgPool2d(k=2, s=2, p=1, count_include_pad)
    # is linear in the maxpool output m:   out[i, j] = 1/4 * sum of
    # m[r, c] over r in {2i-1, 2i}, c in {2j-1, 2j} intersected with the valid
    # range (everything outside is a zero pad).  Encode it as out = B @ m @ A
    # with 0.5 taps in each matrix (0.25 total).  The matrices also produce
    # the all-zero last row/col for even H/W automatically, so there are no
    # parity special cases and no strided lane gathers — the lane-axis (W)
    # reduction rides the MXU, which is idle in this kernel anyway.
    oi = lax.broadcasted_iota(jnp.int32, (Ho, Hm), 0)      # output row index
    ri = lax.broadcasted_iota(jnp.int32, (Ho, Hm), 1)      # maxpool row index
    B = jnp.where((ri == 2 * oi - 1) | (ri == 2 * oi), 0.5, 0.0).astype(f32)
    ci = lax.broadcasted_iota(jnp.int32, (Wm, Wo), 0)      # maxpool col index
    oj = lax.broadcasted_iota(jnp.int32, (Wm, Wo), 1)      # output col index
    A = jnp.where((ci == 2 * oj - 1) | (ci == 2 * oj), 0.5, 0.0).astype(f32)

    def body(c, carry):
        xc = x_ref[0, c]                                   # (H, W), input dtype
        # MaxPool2d(kernel_size=2, stride=1): H (sublane) shift first so the
        # lane-axis shift runs on H-1 rows.  Max is exact in the input dtype.
        a = jnp.maximum(xc[:Hm, :], xc[1:, :])             # (Hm, W)
        m = jnp.maximum(a[:, :Wm], a[:, 1:]).astype(f32)   # (Hm, Wm)
        # Pad + average pool via two tiny MXU matmuls (f32 accumulate).
        t = jnp.dot(B, m, preferred_element_type=f32)      # (Ho, Wm)
        oc = jnp.dot(t, A, preferred_element_type=f32)     # (Ho, Wo)
        o_ref[0, c] = oc.astype(o_ref.dtype)
        return carry

    lax.fori_loop(0, TC, body, 0)


def _round_up(n, m):
    return -(-n // m) * m


def _vmem_params():
    """Generation-aware (budget for tile choice, vmem_limit_bytes)."""
    cap = 64 * 1024 * 1024                     # conservative default (v7x/TC)
    try:
        info = pltpu.get_tpu_info()
        cap = int(getattr(info, "vmem_capacity_bytes", cap)) or cap
    except Exception:
        pass
    budget = int(cap * 0.35)                   # per-step working-set budget
    vmem_limit = min(int(cap * 0.75), 128 * 1024 * 1024)
    return budget, vmem_limit


def _choose_c_tile(N, C, H, W, Ho, Wo, itemsize, budget_bytes, min_steps=8):
    """Largest divisor-of-C channel tile whose per-step footprint fits.

    The channel tile is not a minor block dim, so any divisor of C is
    layout-legal; divisor-based search can therefore never exceed the budget
    (tc=1 is always available).  Footprint accounts for (8,128) lane/sublane
    padding of the VMEM tiles.
    """
    hw_in = _round_up(H, 8) * _round_up(W, 128)
    hw_out = _round_up(Ho, 8) * _round_up(Wo, 128)
    fixed = 8 * hw_in * 4 + (1 << 16)          # per-channel f32 temps + slack

    def per_step(tc):
        # double-buffered input + output blocks, plus loop-local temps.
        return 2 * tc * (hw_in + hw_out) * itemsize + fixed

    divisors = [d for d in range(1, C + 1) if C % d == 0]
    fitting = [d for d in divisors if per_step(d) <= budget_bytes] or [1]
    best = max(fitting)
    # Prefer >= min_steps grid steps (megacore sharding / DMA pipelining) as
    # long as the per-step block stays big enough to amortize step overhead.
    if N * (C // best) < min_steps:
        for d in sorted(fitting, reverse=True):
            if N * (C // d) >= min_steps and per_step(d) >= (1 << 19):
                best = d
                break
    return best


def s3pool(x, *, c_tile=None):
    """StochasticPool2DLayer (inference path, pool_size=2) on NCHW input."""
    N, C, H, W = x.shape
    assert H >= 2 and W >= 2, "MaxPool2d(kernel_size=2) needs H, W >= 2"
    Ho = H // 2 + 1   # AvgPool2d output size with k=2, s=2, p=1
    Wo = W // 2 + 1

    budget, vmem_limit = _vmem_params()
    itemsize = jnp.dtype(x.dtype).itemsize
    tc = c_tile if c_tile is not None else _choose_c_tile(
        N, C, H, W, Ho, Wo, itemsize, budget)
    assert C % tc == 0

    return pl.pallas_call(
        _s3pool_kernel,
        out_shape=jax.ShapeDtypeStruct((N, C, Ho, Wo), x.dtype),
        grid=(N, C // tc),
        in_specs=[pl.BlockSpec((1, tc, H, W), lambda n, c: (n, c, 0, 0))],
        out_specs=pl.BlockSpec((1, tc, Ho, Wo), lambda n, c: (n, c, 0, 0)),
        compiler_params=pltpu.CompilerParams(
            dimension_semantics=("parallel", "parallel"),
            vmem_limit_bytes=vmem_limit),
    )(x)


def _s3pool_reference(x):
    """Pure-JAX reference of the same PyTorch forward (inference branch)."""
    xf = x.astype(jnp.float32)
    # MaxPool2d(kernel_size=2, stride=1)
    m = lax.reduce_window(xf, -jnp.inf, lax.max,
                          window_dimensions=(1, 1, 2, 2),
                          window_strides=(1, 1, 1, 1),
                          padding="VALID")
    # ConstantPad2d((0,1,0,1), 0)
    p = jnp.pad(m, ((0, 0), (0, 0), (0, 1), (0, 1)))
    # AvgPool2d(kernel_size=2, stride=2, padding=1, count_include_pad=True)
    p2 = jnp.pad(p, ((0, 0), (0, 0), (1, 1), (1, 1)))
    s = lax.reduce_window(p2, 0.0, lax.add,
                          window_dimensions=(1, 1, 2, 2),
                          window_strides=(1, 1, 2, 2),
                          padding="VALID")
    return s / 4.0


if __name__ == "__main__":
    key = jax.random.PRNGKey(0)
    k0, k1 = jax.random.split(key)

    # Even spatial dims, fp32 (typical module use).  Tolerance covers MXU
    # fp32 matmul accumulation (multi-pass) rounding differences.
    x = jax.random.normal(k0, (2, 4, 16, 16), dtype=jnp.float32)
    out = jax.block_until_ready(s3pool(x))
    ref = _s3pool_reference(x)
    assert out.shape == ref.shape, (out.shape, ref.shape)
    assert jnp.allclose(out, ref, rtol=1e-4, atol=1e-4), "fp32 even-size mismatch"

    # Odd spatial dims exercise the half-window border handling.
    x_odd = jax.random.normal(k1, (2, 4, 15, 13), dtype=jnp.float32)
    out_odd = jax.block_until_ready(s3pool(x_odd))
    ref_odd = _s3pool_reference(x_odd)
    assert out_odd.shape == ref_odd.shape, (out_odd.shape, ref_odd.shape)
    assert jnp.allclose(out_odd, ref_odd, rtol=1e-4, atol=1e-4), "odd-size mismatch"

    # bfloat16 input: maxpool stays exact in bf16, averaging in f32, bf16 store.
    x_bf16 = x.astype(jnp.bfloat16)
    out_bf16 = jax.block_until_ready(s3pool(x_bf16))
    ref_bf16 = _s3pool_reference(x_bf16)
    assert out_bf16.dtype == jnp.bfloat16
    assert jnp.allclose(out_bf16.astype(jnp.float32), ref_bf16,
                        rtol=2e-2, atol=2e-2), "bf16 mismatch"

    print("KERNEL_OK")
</pallas_src>

<mosaic_0001>
module attributes {stable_mosaic.version = 11 : i64} {
  func.func @_s3pool_kernel(%arg0: i32, %arg1: i32, %arg2: memref<1x4x16x16xf32, #tpu.memory_space<vmem>>, %arg3: memref<1x4x9x9xf32, #tpu.memory_space<vmem>>) attributes {dimension_semantics = [#tpu.dimension_semantics<parallel>, #tpu.dimension_semantics<parallel>], iteration_bounds = array<i64: 2, 1>, scalar_prefetch = 0 : i64, scratch_operands = 0 : i64, tpu.core_type = #tpu.core_type<tc>, window_params = [{transform_indices = @transform_0, window_bounds = array<i64: 1, 4, 16, 16>}, {transform_indices = @transform_1, window_bounds = array<i64: 1, 4, 9, 9>}]} {
    %0 = tpu.iota {dimensions = array<i32: 0>} : vector<9x15xi32>
    %1 = tpu.iota {dimensions = array<i32: 1>} : vector<9x15xi32>
    %c2_i32 = arith.constant 2 : i32
    %2 = vector.broadcast %c2_i32 : i32 to vector<9x15xi32>
    %3 = arith.muli %2, %0 : vector<9x15xi32>
    %c1_i32 = arith.constant 1 : i32
    %4 = vector.broadcast %c1_i32 : i32 to vector<9x15xi32>
    %5 = arith.subi %3, %4 : vector<9x15xi32>
    %6 = arith.cmpi eq, %1, %5 : vector<9x15xi32>
    %c2_i32_0 = arith.constant 2 : i32
    %7 = vector.broadcast %c2_i32_0 : i32 to vector<9x15xi32>
    %8 = arith.muli %7, %0 : vector<9x15xi32>
    %9 = arith.cmpi eq, %1, %8 : vector<9x15xi32>
    %10 = arith.ori %6, %9 : vector<9x15xi1>
    %cst = arith.constant 5.000000e-01 : f32
    %cst_1 = arith.constant 0.000000e+00 : f32
    %11 = vector.broadcast %cst : f32 to vector<9x15xf32>
    %12 = vector.broadcast %cst_1 : f32 to vector<9x15xf32>
    %13 = arith.select %10, %11, %12 : vector<9x15xi1>, vector<9x15xf32>
    %14 = tpu.iota {dimensions = array<i32: 0>} : vector<15x9xi32>
    %15 = tpu.iota {dimensions = array<i32: 1>} : vector<15x9xi32>
    %c2_i32_2 = arith.constant 2 : i32
    %16 = vector.broadcast %c2_i32_2 : i32 to vector<15x9xi32>
    %17 = arith.muli %16, %15 : vector<15x9xi32>
    %c1_i32_3 = arith.constant 1 : i32
    %18 = vector.broadcast %c1_i32_3 : i32 to vector<15x9xi32>
    %19 = arith.subi %17, %18 : vector<15x9xi32>
    %20 = arith.cmpi eq, %14, %19 : vector<15x9xi32>
    %c2_i32_4 = arith.constant 2 : i32
    %21 = vector.broadcast %c2_i32_4 : i32 to vector<15x9xi32>
    %22 = arith.muli %21, %15 : vector<15x9xi32>
    %23 = arith.cmpi eq, %14, %22 : vector<15x9xi32>
    %24 = arith.ori %20, %23 : vector<15x9xi1>
    %cst_5 = arith.constant 5.000000e-01 : f32
    %cst_6 = arith.constant 0.000000e+00 : f32
    %25 = vector.broadcast %cst_5 : f32 to vector<15x9xf32>
    %26 = vector.broadcast %cst_6 : f32 to vector<15x9xf32>
    %27 = arith.select %24, %25, %26 : vector<15x9xi1>, vector<15x9xf32>
    %c0_i32 = arith.constant 0 : i32
    %c4_i32 = arith.constant 4 : i32
    %28 = arith.addi %c0_i32, %c4_i32 : i32
    %c1_i32_7 = arith.constant 1 : i32
    scf.for %arg4 = %c0_i32 to %28 step %c1_i32_7  : i32 {
      %c0 = arith.constant 0 : index
      %29 = arith.index_cast %arg4 : i32 to index
      %c0_9 = arith.constant 0 : index
      %c0_10 = arith.constant 0 : index
      %30 = vector.load %arg2[%c0, %29, %c0_9, %c0_10] : memref<1x4x16x16xf32, #tpu.memory_space<vmem>>, vector<1x1x16x16xf32>
      %31 = vector.shape_cast %30 : vector<1x1x16x16xf32> to vector<16x16xf32>
      %32 = vector.extract_strided_slice %31 {offsets = [0, 0], sizes = [15, 16], strides = [1, 1]} : vector<16x16xf32> to vector<15x16xf32>
      %33 = vector.extract_strided_slice %31 {offsets = [1, 0], sizes = [15, 16], strides = [1, 1]} : vector<16x16xf32> to vector<15x16xf32>
      %34 = arith.maximumf %32, %33 : vector<15x16xf32>
      %35 = vector.extract_strided_slice %34 {offsets = [0, 0], sizes = [15, 15], strides = [1, 1]} : vector<15x16xf32> to vector<15x15xf32>
      %36 = vector.extract_strided_slice %34 {offsets = [0, 1], sizes = [15, 15], strides = [1, 1]} : vector<15x16xf32> to vector<15x15xf32>
      %37 = arith.maximumf %35, %36 : vector<15x15xf32>
      %cst_11 = arith.constant dense<0.000000e+00> : vector<9x15xf32>
      %38 = tpu.matmul %13, %37, %cst_11 {dimension_numbers = #tpu.dot_dimension_numbers<[1], [0], [0], [1], [0, 0, 1, 1], [], []>} : vector<9x15xf32>, vector<15x15xf32>, vector<9x15xf32> -> vector<9x15xf32>
      %cst_12 = arith.constant dense<0.000000e+00> : vector<9x9xf32>
      %39 = tpu.matmul %38, %27, %cst_12 {dimension_numbers = #tpu.dot_dimension_numbers<[1], [0], [0], [1], [0, 0, 1, 1], [], []>} : vector<9x15xf32>, vector<15x9xf32>, vector<9x9xf32> -> vector<9x9xf32>
      %c0_13 = arith.constant 0 : index
      %40 = arith.index_cast %arg4 : i32 to index
      %c0_14 = arith.constant 0 : index
      %c0_15 = arith.constant 0 : index
      %41 = vector.load %arg3[%c0_13, %40, %c0_14, %c0_15] : memref<1x4x9x9xf32, #tpu.memory_space<vmem>>, vector<1x1x9x9xf32>
      %42 = vector.shape_cast %41 : vector<1x1x9x9xf32> to vector<9x9xf32>
      %43 = vector.shape_cast %39 : vector<9x9xf32> to vector<1x1x9x9xf32>
      tpu.vector_store %arg3[%c0_13, %40, %c0_14, %c0_15], %43 {strides = array<i32>} : memref<1x4x9x9xf32, #tpu.memory_space<vmem>>, vector<1x1x9x9xf32>,
    }
    %c4_i32_8 = arith.constant 4 : i32
    return
  }
  func.func @transform_0(%arg0: i32, %arg1: i32) -> (i32, i32, i32, i32) {
    %c0_i32 = arith.constant 0 : i32
    %c0_i32_0 = arith.constant 0 : i32
    %c0_i32_1 = arith.constant 0 : i32
    return %arg0, %arg1, %c0_i32, %c0_i32_0 : i32, i32, i32, i32
  }
  func.func @transform_1(%arg0: i32, %arg1: i32) -> (i32, i32, i32, i32) {
    %c0_i32 = arith.constant 0 : i32
    %c0_i32_0 = arith.constant 0 : i32
    %c0_i32_1 = arith.constant 0 : i32
    return %arg0, %arg1, %c0_i32, %c0_i32_0 : i32, i32, i32, i32
  }
}

</mosaic_0001>

<bundles_post_ra>
// kernel: tpu_custom_call.1
= control target key start
LH: loop header
LB: loop body
LE: loop exit
PB: predicated region body
PF: predicated region fallthrough
CT: control target
= control target key end

     0   :  { %6 = vsyncpa [#allocation3], 0  ;;  %s863_s0 = inlined_call_operand.hbm [shape: f32[2,4,16,16], index: 0, kind: input, shape index: {}]   ;;  %s864_s1 = inlined_call_operand.vmem [shape: f32[2,4,9,9], index: 1, kind: output, shape index: {}]  }
   0x1   :  { %8 = vsyncpa [#allocation3 + $0x1], 0  ;;  %s729_s6 = smov 0   ;;  %s731_s7 = smov 0  }
   0x2   :  { %s733_s8 = smov 0   ;;  %s735_s9 = smov 0  }
   0x3   :  { %s737_s10 = smov 0   ;;  %s739_s11 = smov 0  }
   0x4 LB: > { %s509_s12 = sadd.s32 4294967295, %s707_s11   ;;  %s26_s13 = sadd.s32 1, %s703_s10  ;;  %s707_s11 = sphi %s739_s11, %s14_s11   ;;  %s703_s10 = sphi %s737_s10, %s874_s10   ;;  %s699_s9 = sphi %s735_s9, %s873_s9   ;;  %s695_s8 = sphi %s733_s8, %s872_s8   ;;  %s691_s7 = sphi %s731_s7, %s871_s7   ;;  %s687_s6 = sphi %s729_s6, %s870_s6  }
   0x5   : > { %p28_p0 = scmp.ge.s32.totalorder %s26_s13, 2  ;;  %s35_s14 = sadd.s32 1, %s695_s8 }
   0x6   : > { %p42_p1 = scmp.ne.s32.totalorder %s695_s8, %s691_s7  ;;  %p43_p2 = scmp.eq.s32.totalorder %s707_s11, 0 }
   0x7   : > { %s876_s13 = smov (%p28_p0, %s26_s13), 0  ;;  %p48_p4 = scmp.ne.s32.totalorder %s691_s7, %s687_s6 }
   0x8   : > { %p765_p3 = por %p43_p2, %p42_p1  ;;  %s30_s16 = ssub.s32 %s703_s10, %s876_s13 }
   0x9   : > { %p49_p5 = scmp.eq.s32.totalorder %s509_s12, 0  ;;  %p33_p6 = scmp.eq.s32.totalorder %s30_s16, 0 }
   0xa   : > { %p563_p8 = scmp.lt.s32.totalorder %s707_s11, 2  ;;  %s100_s19 = sand.u32 1, %s695_s8  }
   0xb   : > { %p772_p7 = por %p49_p5, %p48_p4  ;;  %s533_s20 = sshll.u32 %s703_s10, 10 }
   0xc   : > { %s778_s18 = scalar_select %p33_p6, %s695_s8, %s35_s14  }
   0xd   : > { %s513_s21 = sshll.u32 %s100_s19, 6  ;;  %s113_s24 = scalar_lea.hbm %s863_s0, %s533_s20 }
   0xe   : > { %s104_s25 = scalar_lea.vmem [#allocation2], %s513_s21  ;;  %p787_p9 = pnand %p563_p8, %p765_p3 }
   0xf   : > { %s114_s26 = sshll.u32 %s104_s25, 4  ;;  %s101_s28 = scalar_lea.sflag [#allocation3], %s100_s19  ;;  %s115_s26 = int_to_ptr.vmem [resolvable:$true] %s114_s26 }
  0x10   : > { %p627_p10 = pneg %p787_p9  ;;  %s638_s29 = scalar_lea.vmem %s115_s26, 1024 }
  0x11   : > { %p639_p11 = scmp.ne.s32.totalorder %s115_s26, %s638_s29  ;;  %s713_s30 = smov [#allocation2]  }
  0x12   : > { %s643_s2 = sshll.u32 %s713_s30, 4  ;;  %s644_s2 = int_to_ptr.vmem [resolvable:$false] %s643_s2 }
  0x13   : > { %p641_p12 = pnand %p639_p11, %p627_p10  ;;  %s645_s3 = scalar_lea.vmem %s644_s2, 2048 }
  0x14   : > { %p646_p0 = scmp.lt.s32.totalorder %s115_s26, %s644_s2  ;;  %p647_p1 = scmp.lt.s32.totalorder %s645_s3, %s638_s29 }
  0x15   : > { %p642_p13 = pneg %p641_p12 }
  0x16   : > { %p648_p2 = por %p647_p1, %p646_p0 }
  0x18   : > { %p649_p3 = pnand %p648_p2, %p642_p13 }
  0x1a   : > { %652 = shalt.err (!%p649_p3)
}
  0x1b   : > { %s714_s4 = smov 128   ;;  %s715_s5 = smov 8  }
  0x1c   : > { %562 = dma.hbm_to_vmem [thread:$0]  (!%p787_p9), %s113_s24, 1024, %s115_s26, %s101_s28, %s714_s4, %s714_s4, %s715_s5  }
  0x1d   : > { %p516_p4 = scmp.ge.s32.totalorder %s707_s11, 1  ;;  %p122_p5 = scmp.lt.s32.totalorder %s707_s11, 3 }
  0x1f   : > { %p123_p6 = pnand %p516_p4, %p122_p5 }
  0x20   : > { %s128_s6 = sand.u32 (!%p123_p6), 1, %s691_s7  }
  0x21   : > { %126 = sbr.rel (%p123_p6) target bundleno = 575 (0x23f), region = 24  ;;  %s798_s12 = sshll.u32 (!%p123_p6), %s128_s6, 6 }
  0x22   : > { %s129_s14 = scalar_lea.sflag (!%p123_p6), [#allocation3], %s128_s6  ;;  %s132_s15 = scalar_lea.vmem (!%p123_p6), [#allocation2], %s798_s12 }
  0x26   : > { %682 = dma.done.wait (%p772_p7), %s129_s14, 1024  }
  0x27   : > { %684 = vsyncadd (%p772_p7), %s129_s14, 4294966272  ;;  %p158_p8 = scmp.lt.s32.totalorder %s699_s9, 1  ;;  %v168_v0 = vlaneseq  ;;  %v716_v10 = vmov 0.0  }
  0x29   : > { %s878_s9 = smov (!%p158_p8, %s699_s9), 1  ;;  %v169_v1 = vshrl.u32 %v168_v0, 7  ;;  %v172_v2 = vand.u32 127, %v168_v0 }
  0x2a   : > { %s534_s16 = sshll.u32 %s878_s9, 6  ;;  %s816_s9 = smov 0  }
  0x2b   : > { %v170_v3 = vadd.s32 8, %v169_v1  ;;  %v173_v4 = vmul.u32 2, %v169_v1  ;;  %v185_v5 = vmul.u32 2, %v172_v2  ;;  %s810_s21 = scalar_lea.vmem %s864_s1, %s534_s16 }
  0x2d   : > { %v174_v6 = vmul.u32 2, %v170_v3  ;;  %v520_v7 = vadd.s32 4294967295, %v173_v4  ;;  %vm179_vm0 = vcmp.eq.s32.totalorder %v172_v2, %v173_v4  ;;  %v522_v8 = vadd.s32 4294967295, %v185_v5 }
  0x2e   : > { %vm189_vm1 = vcmp.eq.s32.totalorder %v169_v1, %v185_v5  ;;  %vm190_vm7 = vcmp.eq.s32.totalorder %v170_v3, %v185_v5 }
  0x2f   : > { %v521_v9 = vadd.s32 4294967295, %v174_v6  ;;  %vm177_vm2 = vcmp.eq.s32.totalorder %v172_v2, %v520_v7  ;;  %vm180_vm3 = vcmp.eq.s32.totalorder %v172_v2, %v174_v6  ;;  %vm187_vm4 = vcmp.eq.s32.totalorder %v169_v1, %v522_v8 }
  0x30   : > { %vm181_vm5 = vmor %vm177_vm2, %vm179_vm0  ;;  %vm188_vm6 = vcmp.eq.s32.totalorder %v170_v3, %v522_v8 }
  0x31   : > { %vm178_vm8 = vcmp.eq.s32.totalorder %v172_v2, %v521_v9  ;;  %v183_v11 = vsel %vm181_vm5, 0.5, %v716_v10  ;;  %vm812_vm9 = vmor %vm187_vm4, %vm189_vm1 }
  0x32   : > { %vm182_vm10 = vmor %vm178_vm8, %vm180_vm3 }
  0x33   : > { %v184_v13 = vsel %vm182_vm10, 0.5, %v716_v10  ;;  %vm192_vm11 = vmor %vm188_vm6, %vm190_vm7 }
  0x34   : > { %v194_v14 = vsel %vm192_vm11, 0.5, %v716_v10 }
  0x35 LB: >> { %vm207_vm12 = vcmask 1046528   ;;  %s523_s17 = sshll.u32 %s711_s9, 4  ;;  %vm225_vm13 = vcmask 121856   ;;  %s717_s23 = smov 127   ;;  %v718_v26 = vmov 0.5   ;;  %vm397_vm14 = vcmask 65536   ;;  %s711_s9 = sphi %s816_s9, %s200_s9  }
  0x36   : >> { %550 = vmatprep.subr.msk.mxu1 %vm207_vm12, %v194_v14  ;;  %s202_s22 = scalar_lea.vmem %s132_s15, %s523_s17 [#allocation2]  ;;  %547 = vmatprep.mubr.msk.f32.mxu0 %vm225_vm13, %v183_v11  ;;  %s394_s24 = scalar_lea.vmem %s810_s21, %s523_s17  ;;  %vm395_vm15 = vcmask 72704  }
  0x37   : >> { %551 = vmatpush3.msk.msra.mxu1 %vm207_vm12, %v194_v14  ;;  %v204_v15 = vld [vmem:[%s202_s22 + $0x8] sm:$0xff]  ;;  %v203_v16 = vld [vmem:[%s202_s22] sm:$0xff]  ;;  %s200_s9 = sadd.s32 1, %s711_s9  }
  0x38   : >> { %v209_v17 = vrot.slane %v204_v15, 1  ;;  %v208_v18 = vrot.slane %v203_v16, 1  ;;  %552 = vmatprep.subr.msk.mxu1 %vm812_vm9, %v718_v26  ;;  %p197_p7 = scmp.ge.s32.totalorder %s200_s9, 4  }
  0x39   : >> { %553 = vmatpush3.msk.msra.mxu1 %vm812_vm9, %v718_v26 }
  0x3a   : >> { %v214_v19 = vmax.f32 %v204_v15, %v209_v17  ;;  %v210_v20 = vsel %vm207_vm12, %v208_v18, %v209_v17 }
  0x3b   : >> { %v213_v21 = vmax.f32 %v203_v16, %v210_v20 }
  0x3c   : >> { %219 = vrot.lane.b32.xlu0 %v214_v19, %s717_s23 }
  0x40   : >> { %217 = vrot.lane.b32.xlu0 %v213_v21, %s717_s23 }
  0xae   : >> { %v220_v22 = vpop.permute.xlu0 %219 }
  0xaf   : >> { %v224_v23 = vmax.f32 %v214_v19, %v220_v22 }
  0xb1   : >> { %543 = vmatprep.subr.msk.mxu0 %vm207_vm12, %v224_v23 }
  0xb2   : >> { %544 = vmatpush3.msk.msra.mxu0 %vm207_vm12, %v224_v23  ;;  %v218_v24 = vpop.permute.xlu0 %217 }
  0xb3   : >> { %v223_v25 = vmax.f32 %v213_v21, %v218_v24 }
  0xb5   : >> { %545 = vmatprep.subr.mxu0 %v223_v25 }
  0xb6   : >> { %546 = vmatpush3.msra.mxu0 %v223_v25 }
  0xb7   : >> { %548 = vmatmul.mubr.msk.f32.vlgmr.msra.gmra.mxu0 %vm225_vm13, %v184_v13 }
 0x177   : >> { %v549_v27 = vpop.f32.mrf.mxu0 }
 0x179   : >> { %v301_v28 = vpop.f32.mrf.mxu0 }
 0x17a   : >> { %554 = vmatprep.mubr.msk.f32.mxu1 %vm225_vm13, %v301_v28 }
 0x17b   : >> { %555 = vmatmul.mubr.msk.f32.vlgmr.msra.gmra.mxu1 %vm225_vm13, %v549_v27 }
 0x23a   : > { %199 = sbr.rel (!%p197_p7) target bundleno = 53 (0x35), region = 73 }
 0x23b   : >> { %v556_v29 = vpop.f32.mrf.mxu1 }
 0x23c   : >> { %398 = vst.msk [vmem:[%s394_s24 + $0x8] sm:$0x1] %vm397_vm14, %v556_v29 }
 0x23d   : >> { %v385_v30 = vpop.f32.mrf.mxu1 }
 0x23e   : >> { %396 = vst.msk [vmem:[%s394_s24] sm:$0xff] %vm395_vm15, %v385_v30 }
 0x23f PF: > { %s14_s11 = sadd.s32 1, %s707_s11   ;;  %s870_s6 = smov %s691_s7 }
 0x240   : > { %p11_p9 = scmp.ge.s32.totalorder %s14_s11, 4   ;;  %s871_s7 = smov %s695_s8 }
 0x241   : > { %s872_s8 = smov %s778_s18  ;;  %s873_s9 = smov %s703_s10 }
 0x242   : > { %s874_s10 = smov %s876_s13  ;;  %13 = sbr.rel (!%p11_p9) target bundleno = 4 (0x4), region = 84 }
 0x247   :  { %431 = vsyncpa [#allocation3], 1 }
 0x248   :  { %433 = vsyncpa [#allocation3 + $0x1], 1 }

</bundles_post_ra>
